<compile_context>
chip_gen: v6e
topology: v6e:2x2x1
jax: 0.10.0
libtpu: 0.0.40
codegen_flags: <defaults>
</compile_context>

<pallas_src>
import functools

import numpy as np
import jax
import jax.numpy as jnp
from jax.experimental import pallas as pl
from jax.experimental.pallas import tpu as pltpu


# --------------------------------------------------------------------------- #
# Pool-matrix construction (host-side, numpy)
# --------------------------------------------------------------------------- #

def _pooled_size(n: int) -> int:
    # floor((n + 2*1 - 3) / 2) + 1
    return (n - 1) // 2 + 1


def _pool_matrix_np(in_size: int) -> np.ndarray:
    """0/1 matrix M (out, in): M[i, h] = 1 iff input index h lies inside the
    3-wide window (stride 2, pad 1) of output index i (padding contributes 0,
    divisor is always 9 -> count_include_pad=True semantics)."""
    out_size = _pooled_size(in_size)
    i = np.arange(out_size)[:, None]
    h = np.arange(in_size)[None, :]
    return ((h >= 2 * i - 1) & (h <= 2 * i + 1)).astype(np.float32)


def _composed_matrix_np(H: int, W: int, ratio: int):
    """Compose all `ratio` stages into a single (H*W, h_out*w_out) matrix so
    out_flat = x_flat @ K.  Per stage K_s[p*w+q, i*w_out+j] = Hm[i,p]*Wm[j,q]/9,
    i.e. kron(Hm.T, Wm.T)/9 for row-major spatial flattening."""
    K = None
    h, w = H, W
    for _ in range(ratio):
        Hm = _pool_matrix_np(h)                      # (h_out, h)
        Wm = _pool_matrix_np(w)                      # (w_out, w)
        Ks = (np.kron(Hm.T, Wm.T) / np.float32(9.0)).astype(np.float32)
        K = Ks if K is None else (K @ Ks).astype(np.float32)
        h, w = Hm.shape[0], Wm.shape[0]
    return K, h, w


# --------------------------------------------------------------------------- #
# Kernels
# --------------------------------------------------------------------------- #

def _composed_kernel(x_ref, k_ref, o_ref):
    """Small-spatial path: one lane-dense matmul per batch tile."""
    x = x_ref[...]
    if x.dtype != jnp.float32:
        x = x.astype(jnp.float32)
    y = jnp.dot(x, k_ref[...], preferred_element_type=jnp.float32)
    o_ref[...] = y.astype(o_ref.dtype)


def _separable_kernel(num_stages, x_ref, *rest):
    """Large-spatial path.  rest = (WT_0, H_0, WT_1, H_1, ..., o_ref).

    WT_k: (w_k, w_{k+1}) column-pool matrix with the 1/9 divisor folded in (f32).
    H_k : (h_{k+1}, h_k) row-pool matrix (f32).
    """
    o_ref = rest[-1]
    mat_refs = rest[:-1]

    x = x_ref[...]
    if x.dtype != jnp.float32:
        x = x.astype(jnp.float32)

    tb = x.shape[0]
    for k in range(num_stages):
        wt = mat_refs[2 * k][...]        # (Q, Qo), divisor folded in
        hm = mat_refs[2 * k + 1][...]    # (Po, P)
        _, P, Q = x.shape
        Qo = wt.shape[1]
        Po = hm.shape[0]

        # ---- pool the last (W-like) dim: fold the batch tile into the matmul M
        if P % 8 == 0:
            y = jnp.dot(x.reshape(tb * P, Q), wt,
                        preferred_element_type=jnp.float32).reshape(tb, P, Qo)
        else:
            # Sublane-unaligned middle dim: natively-supported batched matmul.
            wt_b = jnp.broadcast_to(wt, (tb, Q, Qo))
            y = jnp.einsum('bpq,bqj->bpj', x, wt_b,
                           preferred_element_type=jnp.float32)

        # ---- pool the middle (H-like) dim (batched MXU matmul)
        # TODO(synk): replace broadcast_to + batched matmul with an
        # axis-alternating 2-D contraction (lane-pool, then swap axis roles next
        # stage) to cut VMEM traffic and MXU pushes on very large images.
        hm_b = jnp.broadcast_to(hm, (tb, Po, P))
        x = jnp.einsum('bip,bpj->bij', hm_b, y, preferred_element_type=jnp.float32)

    o_ref[...] = x.astype(o_ref.dtype)


# --------------------------------------------------------------------------- #
# VMEM accounting + tile selection
# --------------------------------------------------------------------------- #

_MIN_GRID_STEPS = 4      # keep the DMA pipeline primed; even counts split over v7x's 2 TCs
_COMPOSED_MAX_HW = 2048  # small-spatial regime threshold (composed matrix stays tiny)


def _round_up(a: int, m: int) -> int:
    return -(-a // m) * m


def _cdiv(a: int, b: int) -> int:
    return -(-a // b)


def _vmem_capacity_bytes() -> int:
    try:
        cap = getattr(pltpu.get_tpu_info(), "vmem_capacity_bytes", None)
        if cap:
            return int(cap)
    except Exception:
        pass
    return 64 * 1024 * 1024   # conservative default: v7x per-TensorCore VMEM


def _composed_per_row_bytes(HW: int, hw_out: int, itemsize: int):
    """Padded VMEM bytes per batch row (and fixed bytes) for the composed path."""
    hw_p = _round_up(HW, 128)
    ho_p = _round_up(hw_out, 128)
    per_row = (2 * hw_p * itemsize      # double-buffered input block
               + hw_p * 4               # in-kernel f32 upcast copy
               + 2 * ho_p * itemsize    # double-buffered output block
               + ho_p * 4)              # f32 matmul result
    fixed = 2 * _round_up(HW, 8) * ho_p * 4   # resident composed matrix (buffered)
    return per_row, fixed


def _separable_per_row_bytes(H: int, W: int, itemsize: int, ratio: int):
    """Padded VMEM bytes per batch row (and fixed bytes) for the separable path."""
    h, w = H, W
    per_row = 2 * H * _round_up(W, 128) * itemsize   # double-buffered input block
    per_row += H * _round_up(W, 128) * 4             # in-kernel f32 upcast copy
    fixed = 0
    for _ in range(ratio):
        ho, wo = _pooled_size(h), _pooled_size(w)
        per_row += h * _round_up(wo, 128) * 4        # y after W-pool
        per_row += ho * _round_up(wo, 128) * 4       # x after H-pool
        per_row += ho * _round_up(h, 128) * 4        # broadcast hm_b (tb, ho, h)
        fixed += 2 * (_round_up(w, 8) * _round_up(wo, 128)
                      + _round_up(ho, 8) * _round_up(h, 128)) * 4
        h, w = ho, wo
    per_row += 2 * h * _round_up(w, 128) * itemsize  # double-buffered output block
    per_row += h * _round_up(w, 128) * 4             # f32 result before downcast
    return per_row, fixed


def _pick_batch_tile(B: int, per_row: int, fixed: int, budget: int,
                     *, align: int, min_tb: int):
    avail = max(budget - fixed, per_row * min_tb)
    tb = (avail // per_row) // align * align
    tb = max(min_tb, tb)
    # Cap so the grid has >= _MIN_GRID_STEPS steps (pipelining + v7x megacore).
    cap = max(min_tb, _round_up(_cdiv(B, _MIN_GRID_STEPS), align))
    tb = min(tb, cap)
    steps = _cdiv(B, tb)
    if steps % 2:
        steps += 1            # even step count -> both v7x TensorCores get equal work
    return tb, steps


# --------------------------------------------------------------------------- #
# Public wrapper
# --------------------------------------------------------------------------- #

def input_injection(x: jnp.ndarray, ratio: int, *,
                    tile_batch: int | None = None) -> jnp.ndarray:
    """Equivalent of InputInjection(ratio).forward(x) for NCHW float input."""
    N, C, H, W = x.shape
    if ratio == 0:
        return x
    B = N * C
    itemsize = jnp.dtype(x.dtype).itemsize

    vmem_limit = _vmem_capacity_bytes() // 2       # 32 MiB on v7x, 64 MiB on v5e/v6e
    tile_budget = (vmem_limit * 5) // 8            # headroom for compiler temporaries

    HW = H * W
    if HW <= _COMPOSED_MAX_HW:
        # -------- small-spatial regime: one lane-dense matmul per tile --------
        K_np, h, w = _composed_matrix_np(H, W, ratio)
        hw_out = h * w

        per_row, fixed = _composed_per_row_bytes(HW, hw_out, itemsize)
        if tile_batch is None:
            tb, steps = _pick_batch_tile(B, per_row, fixed, tile_budget,
                                         align=8, min_tb=8)
        else:
            tb, steps = tile_batch, _cdiv(B, tile_batch)
        B_pad = steps * tb

        xb = x.reshape(B, HW)
        if B_pad > B:
            xb = jnp.pad(xb, ((0, B_pad - B), (0, 0)))
        K = jnp.asarray(K_np)

        flops = 2 * B_pad * HW * hw_out
        bytes_accessed = B_pad * (HW + hw_out) * itemsize + int(K_np.size) * 4

        out = pl.pallas_call(
            _composed_kernel,
            out_shape=jax.ShapeDtypeStruct((B_pad, hw_out), x.dtype),
            grid=(steps,),
            in_specs=[pl.BlockSpec((tb, HW), lambda b: (b, 0)),
                      pl.BlockSpec((HW, hw_out), lambda b: (0, 0))],  # resident
            out_specs=pl.BlockSpec((tb, hw_out), lambda b: (b, 0)),
            compiler_params=pltpu.CompilerParams(
                dimension_semantics=("parallel",),
                vmem_limit_bytes=vmem_limit),
            cost_estimate=pl.CostEstimate(
                flops=flops, transcendentals=0, bytes_accessed=bytes_accessed),
        )(xb, K)
        return out[:B].reshape(N, C, h, w)

    # -------- large-spatial regime: separable pools --------
    mats_np = []
    h, w = H, W
    stage_flops = 0
    for _ in range(ratio):
        ho, wo = _pooled_size(h), _pooled_size(w)
        mats_np.append(_pool_matrix_np(w).T * np.float32(1.0 / 9.0))   # (w, wo)
        mats_np.append(_pool_matrix_np(h))                             # (ho, h)
        stage_flops += 2 * (h * w * wo + ho * h * wo)
        h, w = ho, wo

    per_row, fixed = _separable_per_row_bytes(H, W, itemsize, ratio)
    if tile_batch is None:
        tb, steps = _pick_batch_tile(B, per_row, fixed, tile_budget,
                                     align=1, min_tb=1)
    else:
        tb, steps = tile_batch, _cdiv(B, tile_batch)
    B_pad = steps * tb

    xb = x.reshape(B, H, W)
    if B_pad > B:
        xb = jnp.pad(xb, ((0, B_pad - B), (0, 0), (0, 0)))
    mats = [jnp.asarray(m) for m in mats_np]

    in_specs = [pl.BlockSpec((tb, H, W), lambda b: (b, 0, 0))]
    for m in mats_np:
        # Constant block index -> pool matrices stay resident across the grid.
        in_specs.append(pl.BlockSpec(m.shape, lambda b: (0, 0)))

    flops = stage_flops * B_pad
    bytes_accessed = ((B_pad * H * W + B_pad * h * w) * itemsize
                      + sum(int(m.size) for m in mats_np) * 4)

    # TODO(synk): for tiny-B / huge-image inputs, add a second "parallel" grid
    # axis tiling H (1-row halo) so v7x megacore still gets >= 4 steps and the
    # per-step block fits the 64 MiB VMEM.
    out = pl.pallas_call(
        functools.partial(_separable_kernel, ratio),
        out_shape=jax.ShapeDtypeStruct((B_pad, h, w), x.dtype),
        grid=(steps,),
        in_specs=in_specs,
        out_specs=pl.BlockSpec((tb, h, w), lambda b: (b, 0, 0)),
        compiler_params=pltpu.CompilerParams(
            dimension_semantics=("parallel",),
            vmem_limit_bytes=vmem_limit),
        cost_estimate=pl.CostEstimate(
            flops=flops, transcendentals=0, bytes_accessed=bytes_accessed),
    )(xb, *mats)
    return out[:B].reshape(N, C, h, w)


# --------------------------------------------------------------------------- #
# Reference + demo
# --------------------------------------------------------------------------- #

def _reference(x: jnp.ndarray, ratio: int) -> jnp.ndarray:
    """Pure-JAX reference: repeated 3x3/stride-2/pad-1 avg pool, divisor 9."""
    for _ in range(ratio):
        s = jax.lax.reduce_window(
            x, 0.0, jax.lax.add,
            window_dimensions=(1, 1, 3, 3),
            window_strides=(1, 1, 2, 2),
            padding=[(0, 0), (0, 0), (1, 1), (1, 1)],
        )
        x = s / 9.0
    return x


if __name__ == "__main__":
    ratio = 2
    key = jax.random.PRNGKey(0)
    x = jax.random.normal(key, (2, 4, 16, 16), dtype=jnp.float32)

    y = input_injection(x, ratio)
    y = jax.block_until_ready(y)

    y_ref = _reference(x, ratio)
    assert y.shape == (2, 4, 4, 4), y.shape
    assert jnp.allclose(y, y_ref, atol=1e-5, rtol=1e-5), "mismatch vs reference"

    print("KERNEL_OK")
</pallas_src>

<mosaic_0001>
module attributes {stable_mosaic.version = 11 : i64} {
  func.func @_composed_kernel(%arg0: i32, %arg1: memref<8x256xf32, #tpu.memory_space<vmem>>, %arg2: memref<256x16xf32, #tpu.memory_space<vmem>>, %arg3: memref<8x16xf32, #tpu.memory_space<vmem>>) attributes {dimension_semantics = [#tpu.dimension_semantics<parallel>], iteration_bounds = array<i64: 2>, scalar_prefetch = 0 : i64, scratch_operands = 0 : i64, tpu.core_type = #tpu.core_type<tc>, window_params = [{transform_indices = @transform_0, window_bounds = array<i64: 8, 256>}, {pipeline_mode = #tpu.pipeline_mode<synchronous>, transform_indices = @transform_1, window_bounds = array<i64: 256, 16>}, {transform_indices = @transform_2, window_bounds = array<i64: 8, 16>}]} {
    %c0 = arith.constant 0 : index
    %c0_0 = arith.constant 0 : index
    %0 = vector.load %arg1[%c0, %c0_0] : memref<8x256xf32, #tpu.memory_space<vmem>>, vector<8x256xf32>
    %c0_1 = arith.constant 0 : index
    %c0_2 = arith.constant 0 : index
    %1 = vector.load %arg2[%c0_1, %c0_2] : memref<256x16xf32, #tpu.memory_space<vmem>>, vector<256x16xf32>
    %cst = arith.constant dense<0.000000e+00> : vector<8x16xf32>
    %2 = tpu.matmul %0, %1, %cst {dimension_numbers = #tpu.dot_dimension_numbers<[1], [0], [0], [1], [0, 0, 1, 1], [], []>} : vector<8x256xf32>, vector<256x16xf32>, vector<8x16xf32> -> vector<8x16xf32>
    %c0_3 = arith.constant 0 : index
    %c0_4 = arith.constant 0 : index
    %3 = vector.load %arg3[%c0_3, %c0_4] : memref<8x16xf32, #tpu.memory_space<vmem>>, vector<8x16xf32>
    tpu.vector_store %arg3[%c0_3, %c0_4], %2 {strides = array<i32>} : memref<8x16xf32, #tpu.memory_space<vmem>>, vector<8x16xf32>,
    return
  }
  func.func @transform_0(%arg0: i32) -> (i32, i32) {
    %c0_i32 = arith.constant 0 : i32
    %c0_i32_0 = arith.constant 0 : i32
    return %arg0, %c0_i32 : i32, i32
  }
  func.func @transform_1(%arg0: i32) -> (i32, i32) {
    %c0_i32 = arith.constant 0 : i32
    %c0_i32_0 = arith.constant 0 : i32
    %c0_i32_1 = arith.constant 0 : i32
    return %c0_i32, %c0_i32_0 : i32, i32
  }
  func.func @transform_2(%arg0: i32) -> (i32, i32) {
    %c0_i32 = arith.constant 0 : i32
    %c0_i32_0 = arith.constant 0 : i32
    return %arg0, %c0_i32 : i32, i32
  }
}

</mosaic_0001>

<bundles_post_ra>
// kernel: tpu_custom_call.1
= control target key start
LH: loop header
LB: loop body
LE: loop exit
PB: predicated region body
PF: predicated region fallthrough
CT: control target
= control target key end

     0   :  { %7 = vsyncpa [#allocation3], 0  ;;  %s672_s0 = inlined_call_operand.vmem [shape: f32[16,256], index: 0, kind: input, shape index: {}]   ;;  %s673_s1 = inlined_call_operand.vmem [shape: f32[256,16], index: 1, kind: input, shape index: {}]   ;;  %s674_s2 = inlined_call_operand.hbm [shape: f32[16,16], index: 2, kind: output, shape index: {}]  }
   0x1   :  { %9 = vsyncpa [#allocation3 + $0x1], 0  ;;  %s485_s9 = smov 0   ;;  %s487_s10 = smov 0  }
   0x2   :  { %s489_s11 = smov 0   ;;  %s491_s12 = smov 0  }
   0x3 LB: > { %s506_s13 = sadd.s32 4294967295, %s467_s12   ;;  %s321_s14 = sadd.s32 4294967294, %s467_s12   ;;  %s467_s12 = sphi %s491_s12, %s680_s12   ;;  %s463_s11 = sphi %s489_s11, %s679_s11   ;;  %s459_s10 = sphi %s487_s10, %s678_s10   ;;  %s455_s9 = sphi %s485_s9, %s677_s9  }
   0x4   : > { %s510_s15 = sadd.s32 1, %s467_s12   ;;  %s69_s16 = sadd.s32 1, %s463_s11 }
   0x5   : > { %s66_s17 = ssub.s32 %s467_s12, %s510_s15  ;;  %p79_p0 = scmp.ne.s32.totalorder %s463_s11, %s459_s10 }
   0x6   : > { %p67_p1 = scmp.eq.s32.totalorder %s66_s17, 0  ;;  %p80_p2 = scmp.eq.s32.totalorder %s506_s13, 1 }
   0x7   : > { %p85_p3 = scmp.ne.s32.totalorder %s459_s10, %s455_s9  ;;  %p86_p4 = scmp.eq.s32.totalorder %s321_s14, 1 }
   0x8   : > { %s521_s18 = scalar_select %p67_p1, %s463_s11, %s69_s16  }
   0x9   : > { %p523_p5 = por %p80_p2, %p79_p0  ;;  %p527_p6 = por %p86_p4, %p85_p3 }
   0xa   : > { %p324_p7 = scmp.ge.s32.totalorder %s467_s12, 1  ;;  %p115_p8 = scmp.lt.s32.totalorder %s467_s12, 3 }
   0xc   : > { %p116_p9 = pnand %p324_p7, %p115_p8 }
   0xd   : > { %p137_p10 = scmp.lt.s32.totalorder (!%p116_p9), %s506_s13, 1  ;;  %s134_s7 = sand.u32 (!%p116_p9), 1, %s459_s10  }
   0xe   : > { %119 = sbr.rel (%p116_p9) target bundleno = 262 (0x106), region = 28  ;;  %s329_s14 = sshll.u32 (!%p116_p9), %s506_s13, 7 }
   0xf   : > { %s260_s23 = scalar_lea.hbm (!%p116_p9), %s674_s2, %s329_s14  ;;  %s469_s25 = smov (!%p116_p9), [#allocation2]  }
  0x10   : > { %s411_s27 = sshll.u32 (!%p116_p9), %s469_s25, 4  ;;  %s412_s27 = int_to_ptr.vmem [resolvable:$false] %s411_s27 }
  0x13   : > { %v175_v0 = vld [vmem:[%s673_s1 + $0xf8] sm:$0xff]  ;;  %v174_v2 = vld [vmem:[%s673_s1 + $0xf0] sm:$0xff]  ;;  %v173_v4 = vld [vmem:[%s673_s1 + $0xe8] sm:$0xff]  ;;  %s138_s3 = scalar_select %p137_p10, %s506_s13, 1  ;;  %vm246_vm0 = vcmask 130048  }
  0x14   : > { %v159_v1 = vld [vmem:[%s673_s1 + $0x78] sm:$0xff]  ;;  %333 = vmatprep.subr.mxu0 %v175_v0  ;;  %v158_v3 = vld [vmem:[%s673_s1 + $0x70] sm:$0xff]  ;;  %v157_v5 = vld [vmem:[%s673_s1 + $0x68] sm:$0xff]  ;;  %s413_s13 = scalar_lea.vmem %s412_s27, 256 }
  0x15   : > { %334 = vmatpush3.msra.mxu0 %v159_v1  ;;  %v172_v6 = vld [vmem:[%s673_s1 + $0xe0] sm:$0xff]  ;;  %s332_s8 = sshll.u32 %s138_s3, 4  ;;  %v171_v8 = vld [vmem:[%s673_s1 + $0xd8] sm:$0xff]  ;;  %v170_v10 = vld [vmem:[%s673_s1 + $0xd0] sm:$0xff] }
  0x16   : > { %335 = vmatprep.subr.mxu0 %v174_v2  ;;  %v156_v7 = vld [vmem:[%s673_s1 + $0x60] sm:$0xff]  ;;  %v155_v9 = vld [vmem:[%s673_s1 + $0x58] sm:$0xff]  ;;  %s568_s26 = scalar_lea.vmem %s672_s0, %s332_s8  ;;  %v154_v11 = vld [vmem:[%s673_s1 + $0x50] sm:$0xff]  ;;  %s325_s8 = sshll.u32 %s134_s7, 3 }
  0x17   : > { %336 = vmatpush3.msra.mxu0 %v158_v3  ;;  %v169_v12 = vld [vmem:[%s673_s1 + $0xc8] sm:$0xff]  ;;  %v168_v15 = vld [vmem:[%s673_s1 + $0xc0] sm:$0xff]  ;;  %v167_v17 = vld [vmem:[%s673_s1 + $0xb8] sm:$0xff]  ;;  %s136_s16 = scalar_lea.vmem [#allocation2], %s325_s8 }
  0x18   : > { %337 = vmatprep.subr.mxu0 %v173_v4  ;;  %v143_v13 = vld [vmem:[%s568_s26 + $0x8] sm:$0xff]  ;;  %v152_v16 = vld [vmem:[%s673_s1 + $0x40] sm:$0xff]  ;;  %v151_v18 = vld [vmem:[%s673_s1 + $0x38] sm:$0xff]  ;;  %s262_s17 = sshll.u32 %s136_s16, 4  ;;  %s263_s17 = int_to_ptr.vmem [resolvable:$true] %s262_s17 }
  0x19   : > { %338 = vmatpush3.msra.mxu0 %v157_v5  ;;  %v153_v14 = vld [vmem:[%s673_s1 + $0x48] sm:$0xff]  ;;  %240 = vmatprep.mubr.f32.mxu0 %v143_v13  ;;  %v166_v19 = vld [vmem:[%s673_s1 + $0xb0] sm:$0xff]  ;;  %v164_v23 = vld [vmem:[%s673_s1 + $0xa0] sm:$0xff]  ;;  %s407_s24 = scalar_lea.vmem %s263_s17, 128  ;;  %p414_p0 = scmp.lt.s32.totalorder %s263_s17, %s412_s27 }
  0x1a   : > { %339 = vmatprep.subr.mxu0 %v172_v6  ;;  %v150_v20 = vld [vmem:[%s673_s1 + $0x30] sm:$0xff]  ;;  %v165_v21 = vld [vmem:[%s673_s1 + $0xa8] sm:$0xff]  ;;  %v148_v24 = vld [vmem:[%s673_s1 + $0x20] sm:$0xff]  ;;  %p408_p11 = scmp.ne.s32.totalorder %s263_s17, %s407_s24  ;;  %p415_p1 = scmp.lt.s32.totalorder %s413_s13, %s407_s24 }
  0x1b   : > { %340 = vmatpush3.msra.mxu0 %v156_v7  ;;  %v149_v22 = vld [vmem:[%s673_s1 + $0x28] sm:$0xff]  ;;  %v163_v25 = vld [vmem:[%s673_s1 + $0x98] sm:$0xff]  ;;  %v162_v27 = vld [vmem:[%s673_s1 + $0x90] sm:$0xff] }
  0x1c   : > { %341 = vmatprep.subr.mxu0 %v171_v8  ;;  %v147_v26 = vld [vmem:[%s673_s1 + $0x18] sm:$0xff]  ;;  %v146_v28 = vld [vmem:[%s673_s1 + $0x10] sm:$0xff]  ;;  %v161_v29 = vld [vmem:[%s673_s1 + $0x88] sm:$0xff]  ;;  %p409_p12 = pnand %p408_p11, %p523_p5  ;;  %p416_p2 = por %p415_p1, %p414_p0 }
  0x1d   : > { %342 = vmatpush3.msra.mxu0 %v155_v9  ;;  %v145_v30 = vld [vmem:[%s673_s1 + $0x8] sm:$0xff]  ;;  %v160_v31 = vld [vmem:[%s673_s1 + $0x80] sm:$0xff] }
  0x1e   : > { %343 = vmatprep.subr.mxu0 %v170_v10  ;;  %v144_v32 = vld [vmem:[%s673_s1] sm:$0xff]  ;;  %p410_p13 = pneg %p409_p12 }
  0x1f   : > { %344 = vmatpush3.msra.mxu0 %v154_v11  ;;  %v142_v33 = vld [vmem:[%s568_s26] sm:$0xff]  ;;  %s249_s26 = scalar_lea.sflag [#allocation3], %s134_s7 }
  0x20   : > { %345 = vmatprep.subr.mxu0 %v169_v12  ;;  %p417_p3 = pnand %p416_p2, %p410_p13 }
  0x21   : > { %346 = vmatpush3.msra.mxu0 %v153_v14 }
  0x22   : > { %347 = vmatprep.subr.mxu0 %v168_v15 }
  0x23   : > { %348 = vmatpush3.msra.mxu0 %v152_v16 }
  0x24   : > { %349 = vmatprep.subr.mxu0 %v167_v17 }
  0x25   : > { %350 = vmatpush3.msra.mxu0 %v151_v18 }
  0x26   : > { %351 = vmatprep.subr.mxu0 %v166_v19 }
  0x27   : > { %352 = vmatpush3.msra.mxu0 %v150_v20 }
  0x28   : > { %353 = vmatprep.subr.mxu0 %v165_v21 }
  0x29   : > { %354 = vmatpush3.msra.mxu0 %v149_v22 }
  0x2a   : > { %355 = vmatprep.subr.mxu0 %v164_v23 }
  0x2b   : > { %356 = vmatpush3.msra.mxu0 %v148_v24 }
  0x2c   : > { %357 = vmatprep.subr.mxu0 %v163_v25 }
  0x2d   : > { %358 = vmatpush3.msra.mxu0 %v147_v26 }
  0x2e   : > { %359 = vmatprep.subr.mxu0 %v162_v27 }
  0x2f   : > { %360 = vmatpush3.msra.mxu0 %v146_v28 }
  0x30   : > { %361 = vmatprep.subr.mxu0 %v161_v29 }
  0x31   : > { %362 = vmatpush3.msra.mxu0 %v145_v30 }
  0x32   : > { %363 = vmatprep.subr.mxu0 %v160_v31 }
  0x33   : > { %364 = vmatpush3.msra.mxu0 %v144_v32 }
  0x34   : > { %241 = vmatmul.mubr.f32.vlgmr.msra.gmra.mxu0 %v142_v33 }
  0xf4   : > { %v365_v34 = vpop.f32.mrf.mxu0 }
  0xf6   : > { %v366_v35 = vpop.f32.mrf.mxu0 }
  0xf7   : > { %v367_v36 = vadd.f32 %v366_v35, %v365_v34 }
  0xf9   : > { %247 = vst.msk [vmem:[%s136_s16] sm:$0xff] %vm246_vm0, %v367_v36 }
  0xfa   : > { %420 = shalt.err (!%p417_p3)
}
  0xfb   : > { %s421_s28 = scalar_lea.hbm %s260_s23, 128  ;;  %s425_s3 = scalar_lea.hbm %s674_s2, 256 }
  0xfc   : > { %p422_p4 = scmp.ne.s32.totalorder %s260_s23, %s421_s28  ;;  %p426_p9 = scmp.lt.s32.totalorder %s260_s23, %s674_s2 }
  0xfd   : > { %p427_p10 = scmp.lt.s32.totalorder %s425_s3, %s421_s28 }
  0xfe   : > { %p423_p7 = pnand %p422_p4, %p523_p5 }
  0xff   : > { %p428_p11 = por %p427_p10, %p426_p9 }
 0x100   : > { %p424_p8 = pneg %p423_p7 }
 0x102   : > { %p429_p12 = pnand %p428_p11, %p424_p8 }
 0x104   : > { %432 = shalt.err (!%p429_p12)
}
 0x105   : > { %368 = dma.vmem_to_hbm [thread:$0]  (%p523_p5), %s263_s17, 128, %s260_s23, %s249_s26  }
 0x106 PF: > { %p374_p13 = scmp.ge.s32.totalorder %s467_s12, 2  ;;  %s274_s6 = sand.u32 1, %s455_s9  }
 0x107   : > { %s275_s7 = scalar_lea.sflag [#allocation3], %s274_s6 }
 0x108   : > { %p371_p0 = pnand %p374_p13, %p527_p6 }
 0x10a   : > { %p372_p1 = pneg %p371_p0 }
 0x10c   : > { %450 = dma.done.wait (%p372_p1), %s275_s7, 128  }
 0x10d   : > { %452 = vsyncadd (%p372_p1), %s275_s7, 4294967168  ;;  %p12_p2 = scmp.ge.s32.totalorder %s510_s15, 4   ;;  %s677_s9 = smov %s459_s10 }
 0x10e   : > { %s678_s10 = smov %s463_s11  ;;  %s679_s11 = smov %s521_s18 }
 0x10f   : > { %s680_s12 = smov %s510_s15  ;;  %14 = sbr.rel (!%p12_p2) target bundleno = 3 (0x3), region = 63 }
 0x114   :  { %280 = vsyncpa [#allocation3], 1 }
 0x115   :  { %282 = vsyncpa [#allocation3 + $0x1], 1 }

</bundles_post_ra>
